<compile_context>
chip_gen: v5e
topology: v5e:2x2
jax: 0.10.0
libtpu: 0.0.40
codegen_flags: <defaults>
</compile_context>

<pallas_src>
import jax
import jax.numpy as jnp
from jax.experimental import pallas as pl
from jax.experimental.pallas import tpu as pltpu

# ---- small, module-consistent shapes -------------------------------------
NUM_AGENTS = 2
STATE_SIZE = 8
H_SIZES = [32, 16]
ACTION_SIZE = 4
BATCH = 256                    # rollout-chunk size for the demo (2 grid steps)

A = NUM_AGENTS
AS = A * STATE_SIZE            # 16  (flattened input width)
AH0 = A * H_SIZES[0]           # 64  (block-diag hidden 0 width)
AH1 = A * H_SIZES[1]           # 32  (block-diag hidden 1 width)
ANA = A * ACTION_SIZE          # 8   (flattened logits width)

# packed transposed-weight slab: W1_bd.T (64 rows) | W2_bd.T (32) | W3_bd.T (8->16 padded)
WT_ROWS = AH0 + AH1 + 16       # 112 (multiple of 16 -> clean bf16 sublane tiling)
WT_COLS = AH0                  # 64
B_ROWS = AH0                   # 64  (bias slab rows)
B_COLS = 8                     # cols 0..2 used


def agent_mlp_kernel(x_ref, w_ref, b_ref, probs_ref, logp_ref):
    """Fused block-diagonal per-agent MLP + segmented softmax, batch on lanes.

    x_ref    : (AS, bb)        bf16 flattened states, one timestep per lane
    w_ref    : (WT_ROWS, WT_COLS) bf16 packed transposed block-diagonal weights:
                 rows [  0, 64) cols [0,16) = W1_bd.T (AH0, AS)
                 rows [ 64, 96) cols [0,64) = W2_bd.T (AH1, AH0)
                 rows [ 96,112) cols [0,32) = W3_bd.T (ANA, AH1), zero-padded to 16 rows
    b_ref    : (B_ROWS, B_COLS) f32  col0[:64]=b1, col1[:32]=b2, col2[:8]=b3
    probs_ref: (ANA, bb)       f32  per-agent softmax probabilities
    logp_ref : (ANA, bb)       f32  per-agent log-probabilities (stable)
    """
    x = x_ref[...]                                               # (16, bb) bf16

    w1t = w_ref[0:AH0, 0:AS]                                     # (64, 16) bf16
    w2t = w_ref[AH0:AH0 + AH1, 0:AH0]                            # (32, 64) bf16
    w3t = w_ref[AH0 + AH1:WT_ROWS, 0:AH1]                        # (16, 32) bf16, rows 8..15 zero

    b1 = b_ref[0:AH0, 0:1]                                       # (64, 1) f32
    b2 = b_ref[0:AH1, 1:2]                                       # (32, 1) f32
    b3 = b_ref[0:ANA, 2:3]                                       # (8, 1)  f32

    # 3 fused block-diagonal matmuls, batch on the MXU N-dimension (bb lanes).
    h0 = jnp.dot(w1t, x, preferred_element_type=jnp.float32) + b1          # (64, bb)
    h0 = jnp.maximum(h0, 0.0)
    h1 = jnp.dot(w2t, h0.astype(jnp.bfloat16),
                 preferred_element_type=jnp.float32) + b2                  # (32, bb)
    h1 = jnp.maximum(h1, 0.0)
    lg16 = jnp.dot(w3t, h1.astype(jnp.bfloat16),
                   preferred_element_type=jnp.float32)                     # (16, bb)
    logits = lg16[0:ANA, :] + b3                                           # (8, bb)

    # Numerically-stable softmax per agent segment of ACTION_SIZE sublanes.
    for a in range(NUM_AGENTS):                      # static unroll (A is tiny)
        lo, hi = a * ACTION_SIZE, (a + 1) * ACTION_SIZE
        lg = logits[lo:hi, :]                        # (4, bb)
        m = jnp.max(lg, axis=0, keepdims=True)       # (1, bb)   XLU
        z = lg - m
        e = jnp.exp(z)                               # EUP
        s = jnp.sum(e, axis=0, keepdims=True)        # (1, bb)   XLU
        inv = pl.reciprocal(s, approx=True)          # EUP slot (nearly free)
        probs_ref[lo:hi, :] = e * inv                # sublane-slice store, lane-dense
        logp_ref[lo:hi, :] = z - jnp.log(s)


def _round_up(x, m):
    return (x + m - 1) // m * m


def agent_forward(states_bas, packed_params, *, block_b=None):
    """states_bas: (B, A, S) float32 rollout chunk.

    Returns (probs, log_probs), each (B, A, ACTION_SIZE) float32.
    """
    w_packed, b_packed = packed_params
    Bsz = states_bas.shape[0]

    if block_b is None:
        # Lane-aligned (multiple of 128) batch tile; aim for >=2 grid steps so the
        # "parallel" axis shards across v7x's 2 TensorCores; cap at 8192 lanes
        # (tile footprint ~8 MiB -> fits the default scoped VMEM on every gen).
        block_b = max(128, min(8192, _round_up(pl.cdiv(Bsz, 2), 128)))
    assert block_b % 128 == 0

    Bp = _round_up(Bsz, block_b)                     # pad instead of hard assert
    grid = (Bp // block_b,)

    # Batch-on-lanes layout: (Bsz, AS) -> (AS, Bp), bf16 for the MXU / half DMA bytes.
    x_t = states_bas.reshape(Bsz, AS).T              # (AS, Bsz)
    if Bp != Bsz:
        x_t = jnp.pad(x_t, ((0, 0), (0, Bp - Bsz)))
    x_t = x_t.astype(jnp.bfloat16)

    probs_t, logp_t = pl.pallas_call(
        agent_mlp_kernel,
        out_shape=(jax.ShapeDtypeStruct((ANA, Bp), jnp.float32),
                   jax.ShapeDtypeStruct((ANA, Bp), jnp.float32)),
        grid_spec=pltpu.PrefetchScalarGridSpec(
            num_scalar_prefetch=0,
            grid=grid,
            in_specs=[
                pl.BlockSpec((AS, block_b), lambda i: (0, i)),        # states chunk
                pl.BlockSpec((WT_ROWS, WT_COLS), lambda i: (0, 0)),   # packed weights
                pl.BlockSpec((B_ROWS, B_COLS), lambda i: (0, 0)),     # packed biases
            ],
            out_specs=[
                pl.BlockSpec((ANA, block_b), lambda i: (0, i)),       # probs
                pl.BlockSpec((ANA, block_b), lambda i: (0, i)),       # log-probs
            ],
        ),
        compiler_params=pltpu.CompilerParams(
            dimension_semantics=("parallel",),        # megacore-shardable on v7x
            vmem_limit_bytes=32 * 1024 * 1024),
    )(x_t, w_packed, b_packed)

    probs = probs_t.T[:Bsz].reshape(Bsz, NUM_AGENTS, ACTION_SIZE)
    logp = logp_t.T[:Bsz].reshape(Bsz, NUM_AGENTS, ACTION_SIZE)
    return probs, logp


# -------------------- parameter construction (one-time, outside kernel) ----
def init_params(key):
    """Per-agent parameter init (PyTorch-Linear-style U(-1/sqrt(fan_in), +...))."""
    sizes = [STATE_SIZE] + H_SIZES + [ACTION_SIZE]
    keys = jax.random.split(key, 2 * (len(sizes) - 1))
    params = []
    for l in range(len(sizes) - 1):
        fan_in, fan_out = sizes[l], sizes[l + 1]
        bound = 1.0 / jnp.sqrt(fan_in)
        w = jax.random.uniform(keys[2 * l], (NUM_AGENTS, fan_in, fan_out),
                               minval=-bound, maxval=bound, dtype=jnp.float32)
        b = jax.random.uniform(keys[2 * l + 1], (NUM_AGENTS, fan_out),
                               minval=-bound, maxval=bound, dtype=jnp.float32)
        params += [w, b]
    return tuple(params)


def pack_params(params):
    """Build transposed block-diagonal weight slab (bf16) + bias slab (f32)."""
    w1, b1, w2, b2, w3, b3 = params

    def block_diag_t(w):  # (A, fin, fout) -> transposed block-diag (A*fout, A*fin)
        a, fin, fout = w.shape
        eye = jnp.eye(a, dtype=w.dtype)
        bd = jnp.einsum('aio,ab->aibo', w, eye).reshape(a * fin, a * fout)
        return bd.T

    w1t = block_diag_t(w1)   # (64, 16)
    w2t = block_diag_t(w2)   # (32, 64)
    w3t = block_diag_t(w3)   # (8, 32)

    w_packed = jnp.zeros((WT_ROWS, WT_COLS), jnp.float32)
    w_packed = w_packed.at[0:AH0, 0:AS].set(w1t)
    w_packed = w_packed.at[AH0:AH0 + AH1, 0:AH0].set(w2t)
    w_packed = w_packed.at[AH0 + AH1:AH0 + AH1 + ANA, 0:AH1].set(w3t)
    w_packed = w_packed.astype(jnp.bfloat16)

    b_packed = jnp.zeros((B_ROWS, B_COLS), jnp.float32)
    b_packed = b_packed.at[0:AH0, 0].set(b1.reshape(-1))
    b_packed = b_packed.at[0:AH1, 1].set(b2.reshape(-1))
    b_packed = b_packed.at[0:ANA, 2].set(b3.reshape(-1))
    return w_packed, b_packed


def reference_forward(states_bas, params):
    w1, b1, w2, b2, w3, b3 = params
    h0 = jax.nn.relu(jnp.einsum('bas,ash->bah', states_bas, w1) + b1)
    h1 = jax.nn.relu(jnp.einsum('bah,ahk->bak', h0, w2) + b2)
    logits = jnp.einsum('bak,akn->ban', h1, w3) + b3
    return jax.nn.softmax(logits, axis=-1)


if __name__ == "__main__":
    key = jax.random.PRNGKey(0)
    pkey, skey, akey = jax.random.split(key, 3)

    params = init_params(pkey)
    packed = pack_params(params)

    # Rollout chunk of BATCH timesteps, each with one state per agent.
    states = jax.random.normal(skey, (BATCH, NUM_AGENTS, STATE_SIZE),
                               dtype=jnp.float32)

    probs, logp = agent_forward(states, packed)
    probs, logp = jax.block_until_ready((probs, logp))

    # Correctness check against a plain-JAX f32 reference (tolerances loosened
    # because matmul inputs are bf16 and the softmax divide uses the approximate
    # EUP reciprocal).
    ref = reference_forward(states, params)
    assert jnp.allclose(probs, ref, atol=2e-2, rtol=2e-2), (probs, ref)
    assert jnp.allclose(jnp.sum(probs, axis=-1), 1.0, atol=5e-3)
    assert jnp.allclose(logp, jnp.log(ref + 1e-30), atol=2e-2, rtol=2e-2)

    # TODO(synk): the module samples with host-side np.random.choice(a_size, p=probs);
    # approximated here with jax.random.categorical on kernel-produced log-probs.
    actions = jax.random.categorical(akey, logp, axis=-1)
    jax.block_until_ready(actions)

    print("KERNEL_OK")
</pallas_src>

<mosaic_0001>
module attributes {stable_mosaic.version = 11 : i64} {
  func.func @agent_mlp_kernel(%arg0: i32, %arg1: memref<16x128xbf16, #tpu.memory_space<vmem>>, %arg2: memref<112x64xbf16, #tpu.memory_space<vmem>>, %arg3: memref<64x8xf32, #tpu.memory_space<vmem>>, %arg4: memref<8x128xf32, #tpu.memory_space<vmem>>, %arg5: memref<8x128xf32, #tpu.memory_space<vmem>>) attributes {dimension_semantics = [#tpu.dimension_semantics<parallel>], iteration_bounds = array<i64: 2>, scalar_prefetch = 0 : i64, scratch_operands = 0 : i64, tpu.core_type = #tpu.core_type<tc>, window_params = [{transform_indices = @transform_0, window_bounds = array<i64: 16, 128>}, {pipeline_mode = #tpu.pipeline_mode<synchronous>, transform_indices = @transform_1, window_bounds = array<i64: 112, 64>}, {pipeline_mode = #tpu.pipeline_mode<synchronous>, transform_indices = @transform_2, window_bounds = array<i64: 64, 8>}, {transform_indices = @transform_3, window_bounds = array<i64: 8, 128>}, {transform_indices = @transform_4, window_bounds = array<i64: 8, 128>}]} {
    %c0 = arith.constant 0 : index
    %c0_0 = arith.constant 0 : index
    %0 = vector.load %arg1[%c0, %c0_0] : memref<16x128xbf16, #tpu.memory_space<vmem>>, vector<16x128xbf16>
    %c0_1 = arith.constant 0 : index
    %c0_2 = arith.constant 0 : index
    %1 = vector.load %arg2[%c0_1, %c0_2] : memref<112x64xbf16, #tpu.memory_space<vmem>>, vector<64x16xbf16>
    %c64 = arith.constant 64 : index
    %c0_3 = arith.constant 0 : index
    %2 = vector.load %arg2[%c64, %c0_3] : memref<112x64xbf16, #tpu.memory_space<vmem>>, vector<32x64xbf16>
    %c96 = arith.constant 96 : index
    %c0_4 = arith.constant 0 : index
    %3 = vector.load %arg2[%c96, %c0_4] : memref<112x64xbf16, #tpu.memory_space<vmem>>, vector<16x32xbf16>
    %c0_5 = arith.constant 0 : index
    %c0_6 = arith.constant 0 : index
    %4 = vector.load %arg3[%c0_5, %c0_6] : memref<64x8xf32, #tpu.memory_space<vmem>>, vector<64x1xf32>
    %c0_7 = arith.constant 0 : index
    %c1 = arith.constant 1 : index
    %5 = vector.load %arg3[%c0_7, %c1] : memref<64x8xf32, #tpu.memory_space<vmem>>, vector<32x1xf32>
    %c0_8 = arith.constant 0 : index
    %c2 = arith.constant 2 : index
    %6 = vector.load %arg3[%c0_8, %c2] : memref<64x8xf32, #tpu.memory_space<vmem>>, vector<8x1xf32>
    %cst = arith.constant dense<0.000000e+00> : vector<64x128xf32>
    %7 = tpu.matmul %1, %0, %cst {dimension_numbers = #tpu.dot_dimension_numbers<[1], [0], [0], [1], [0, 0, 1, 1], [], []>} : vector<64x16xbf16>, vector<16x128xbf16>, vector<64x128xf32> -> vector<64x128xf32>
    %8 = vector.broadcast %4 : vector<64x1xf32> to vector<64x128xf32>
    %9 = arith.addf %7, %8 : vector<64x128xf32>
    %cst_9 = arith.constant 0.000000e+00 : f32
    %10 = vector.broadcast %cst_9 : f32 to vector<64x128xf32>
    %11 = arith.maximumf %9, %10 : vector<64x128xf32>
    %12 = arith.truncf %11 : vector<64x128xf32> to vector<64x128xbf16>
    %cst_10 = arith.constant dense<0.000000e+00> : vector<32x128xf32>
    %13 = tpu.matmul %2, %12, %cst_10 {dimension_numbers = #tpu.dot_dimension_numbers<[1], [0], [0], [1], [0, 0, 1, 1], [], []>} : vector<32x64xbf16>, vector<64x128xbf16>, vector<32x128xf32> -> vector<32x128xf32>
    %14 = vector.broadcast %5 : vector<32x1xf32> to vector<32x128xf32>
    %15 = arith.addf %13, %14 : vector<32x128xf32>
    %cst_11 = arith.constant 0.000000e+00 : f32
    %16 = vector.broadcast %cst_11 : f32 to vector<32x128xf32>
    %17 = arith.maximumf %15, %16 : vector<32x128xf32>
    %18 = arith.truncf %17 : vector<32x128xf32> to vector<32x128xbf16>
    %cst_12 = arith.constant dense<0.000000e+00> : vector<16x128xf32>
    %19 = tpu.matmul %3, %18, %cst_12 {dimension_numbers = #tpu.dot_dimension_numbers<[1], [0], [0], [1], [0, 0, 1, 1], [], []>} : vector<16x32xbf16>, vector<32x128xbf16>, vector<16x128xf32> -> vector<16x128xf32>
    %20 = vector.extract_strided_slice %19 {offsets = [0, 0], sizes = [8, 128], strides = [1, 1]} : vector<16x128xf32> to vector<8x128xf32>
    %21 = vector.broadcast %6 : vector<8x1xf32> to vector<8x128xf32>
    %22 = arith.addf %20, %21 : vector<8x128xf32>
    %23 = vector.extract_strided_slice %22 {offsets = [0, 0], sizes = [4, 128], strides = [1, 1]} : vector<8x128xf32> to vector<4x128xf32>
    %cst_13 = arith.constant dense<0xFF800000> : vector<128xf32>
    %24 = vector.multi_reduction <maximumf>, %23, %cst_13 [0] : vector<4x128xf32> to vector<128xf32>
    %25 = vector.shape_cast %24 : vector<128xf32> to vector<1x128xf32>
    %26 = vector.broadcast %25 : vector<1x128xf32> to vector<4x128xf32>
    %27 = arith.subf %23, %26 : vector<4x128xf32>
    %28 = math.exp %27 : vector<4x128xf32>
    %cst_14 = arith.constant dense<0.000000e+00> : vector<128xf32>
    %29 = vector.multi_reduction <add>, %28, %cst_14 [0] : vector<4x128xf32> to vector<128xf32>
    %30 = vector.shape_cast %29 : vector<128xf32> to vector<1x128xf32>
    %31 = tpu.reciprocal %30 {approx = true} : vector<1x128xf32> -> vector<1x128xf32>
    %32 = vector.broadcast %31 : vector<1x128xf32> to vector<4x128xf32>
    %33 = arith.mulf %28, %32 : vector<4x128xf32>
    %c0_15 = arith.constant 0 : index
    %c0_16 = arith.constant 0 : index
    %34 = vector.load %arg4[%c0_15, %c0_16] : memref<8x128xf32, #tpu.memory_space<vmem>>, vector<4x128xf32>
    tpu.vector_store %arg4[%c0_15, %c0_16], %33 {strides = array<i32>} : memref<8x128xf32, #tpu.memory_space<vmem>>, vector<4x128xf32>,
    %35 = math.log %30 : vector<1x128xf32>
    %36 = vector.broadcast %35 : vector<1x128xf32> to vector<4x128xf32>
    %37 = arith.subf %27, %36 : vector<4x128xf32>
    %c0_17 = arith.constant 0 : index
    %c0_18 = arith.constant 0 : index
    %38 = vector.load %arg5[%c0_17, %c0_18] : memref<8x128xf32, #tpu.memory_space<vmem>>, vector<4x128xf32>
    tpu.vector_store %arg5[%c0_17, %c0_18], %37 {strides = array<i32>} : memref<8x128xf32, #tpu.memory_space<vmem>>, vector<4x128xf32>,
    %39 = vector.extract_strided_slice %22 {offsets = [4, 0], sizes = [4, 128], strides = [1, 1]} : vector<8x128xf32> to vector<4x128xf32>
    %cst_19 = arith.constant dense<0xFF800000> : vector<128xf32>
    %40 = vector.multi_reduction <maximumf>, %39, %cst_19 [0] : vector<4x128xf32> to vector<128xf32>
    %41 = vector.shape_cast %40 : vector<128xf32> to vector<1x128xf32>
    %42 = vector.broadcast %41 : vector<1x128xf32> to vector<4x128xf32>
    %43 = arith.subf %39, %42 : vector<4x128xf32>
    %44 = math.exp %43 : vector<4x128xf32>
    %cst_20 = arith.constant dense<0.000000e+00> : vector<128xf32>
    %45 = vector.multi_reduction <add>, %44, %cst_20 [0] : vector<4x128xf32> to vector<128xf32>
    %46 = vector.shape_cast %45 : vector<128xf32> to vector<1x128xf32>
    %47 = tpu.reciprocal %46 {approx = true} : vector<1x128xf32> -> vector<1x128xf32>
    %48 = vector.broadcast %47 : vector<1x128xf32> to vector<4x128xf32>
    %49 = arith.mulf %44, %48 : vector<4x128xf32>
    %c4 = arith.constant 4 : index
    %c0_21 = arith.constant 0 : index
    %50 = vector.load %arg4[%c4, %c0_21] : memref<8x128xf32, #tpu.memory_space<vmem>>, vector<4x128xf32>
    tpu.vector_store %arg4[%c4, %c0_21], %49 {strides = array<i32>} : memref<8x128xf32, #tpu.memory_space<vmem>>, vector<4x128xf32>,
    %51 = math.log %46 : vector<1x128xf32>
    %52 = vector.broadcast %51 : vector<1x128xf32> to vector<4x128xf32>
    %53 = arith.subf %43, %52 : vector<4x128xf32>
    %c4_22 = arith.constant 4 : index
    %c0_23 = arith.constant 0 : index
    %54 = vector.load %arg5[%c4_22, %c0_23] : memref<8x128xf32, #tpu.memory_space<vmem>>, vector<4x128xf32>
    tpu.vector_store %arg5[%c4_22, %c0_23], %53 {strides = array<i32>} : memref<8x128xf32, #tpu.memory_space<vmem>>, vector<4x128xf32>,
    return
  }
  func.func @transform_0(%arg0: i32) -> (i32, i32) {
    %c0_i32 = arith.constant 0 : i32
    %c0_i32_0 = arith.constant 0 : i32
    return %c0_i32, %arg0 : i32, i32
  }
  func.func @transform_1(%arg0: i32) -> (i32, i32) {
    %c0_i32 = arith.constant 0 : i32
    %c0_i32_0 = arith.constant 0 : i32
    %c0_i32_1 = arith.constant 0 : i32
    return %c0_i32, %c0_i32_0 : i32, i32
  }
  func.func @transform_2(%arg0: i32) -> (i32, i32) {
    %c0_i32 = arith.constant 0 : i32
    %c0_i32_0 = arith.constant 0 : i32
    %c0_i32_1 = arith.constant 0 : i32
    return %c0_i32, %c0_i32_0 : i32, i32
  }
  func.func @transform_3(%arg0: i32) -> (i32, i32) {
    %c0_i32 = arith.constant 0 : i32
    %c0_i32_0 = arith.constant 0 : i32
    return %c0_i32, %arg0 : i32, i32
  }
  func.func @transform_4(%arg0: i32) -> (i32, i32) {
    %c0_i32 = arith.constant 0 : i32
    %c0_i32_0 = arith.constant 0 : i32
    return %c0_i32, %arg0 : i32, i32
  }
}

</mosaic_0001>

<bundles_post_ra>
// kernel: tpu_custom_call.1
= control target key start
LH: loop header
LB: loop body
LE: loop exit
PB: predicated region body
PF: predicated region fallthrough
CT: control target
= control target key end

     0   :  { %10 = vsyncpa [#allocation4], 0  ;;  %s1115_s0 = inlined_call_operand.vmem [shape: bf16[16,256], index: 0, kind: input, shape index: {}]   ;;  %s1116_s1 = inlined_call_operand.vmem [shape: bf16[112,64], index: 1, kind: input, shape index: {}]   ;;  %s1117_s2 = inlined_call_operand.vmem [shape: f32[64,8], index: 2, kind: input, shape index: {}]   ;;  %s1118_s3 = inlined_call_operand.hbm [shape: f32[8,256], index: 3, kind: output, shape index: {0}]   ;;  %s1119_s4 = inlined_call_operand.hbm [shape: f32[8,256], index: 4, kind: output, shape index: {1}]  }
   0x1   :  { %12 = vsyncpa [#allocation4 + $0x1], 0 }
   0x2   :  { %13 = vsyncpa [#allocation6], 0 }
   0x3   :  { %15 = vsyncpa [#allocation6 + $0x1], 0  ;;  %s924_s15 = smov 0   ;;  %s926_s16 = smov 0  }
   0x4   :  { %s928_s17 = smov 0   ;;  %s930_s18 = smov 0  }
   0x5 LB: > { %s669_s19 = sadd.s32 4294967295, %s894_s18   ;;  %s670_s20 = sadd.s32 4294967294, %s894_s18   ;;  %s894_s18 = sphi %s930_s18, %s1125_s18   ;;  %s890_s17 = sphi %s928_s17, %s1124_s17   ;;  %s886_s16 = sphi %s926_s16, %s1123_s16   ;;  %s882_s15 = sphi %s924_s15, %s1122_s15  }
   0x6   : > { %s947_s21 = sadd.s32 1, %s894_s18   ;;  %s28_s22 = sadd.s32 1, %s890_s17 }
   0x7   : > { %s25_s23 = ssub.s32 %s894_s18, %s947_s21  ;;  %p35_p0 = scmp.ne.s32.totalorder %s890_s17, %s886_s16 }
   0x8   : > { %p26_p1 = scmp.eq.s32.totalorder %s25_s23, 0  ;;  %p36_p2 = scmp.eq.s32.totalorder %s894_s18, 0 }
   0x9   : > { %p107_p3 = scmp.eq.s32.totalorder %s669_s19, 1  ;;  %p112_p4 = scmp.ne.s32.totalorder %s886_s16, %s882_s15 }
   0xa   : > { %s960_s24 = scalar_select %p26_p1, %s890_s17, %s28_s22  }
   0xb   : > { %p37_p5 = por %p36_p2, %p35_p0  ;;  %p962_p6 = por %p107_p3, %p35_p0 }
   0xc   : > { %p113_p7 = scmp.eq.s32.totalorder %s670_s20, 1  ;;  %p672_p9 = scmp.ge.s32.totalorder %s894_s18, 2 }
   0xe   : > { %p966_p8 = por %p113_p7, %p112_p4  ;;  %161 = sbr.rel (%p672_p9) target bundleno = 25 (0x19), region = 24 }
  0x13   : > { %164 = sbr.rel (!%p37_p5) target bundleno = 25 (0x19), region = 28  ;;  %s166_s27 = sand.u32 (%p37_p5), 1, %s890_s17  }
  0x14   : > { %s674_s28 = sshll.u32 (%p37_p5), %s894_s18, 2  ;;  %s673_s29 = sshll.u32 (%p37_p5), %s166_s27, 3 }
  0x15   : > { %s170_s6 = scalar_lea.vmem (%p37_p5), %s1115_s0, %s674_s28  ;;  %s168_s7 = scalar_lea.vmem (%p37_p5), [#allocation2], %s673_s29 }
  0x16   : > { %v187_v0 = vld [vmem:[%s170_s6] sm:$0xf] (%p37_p5)  ;;  %v189_v1 = vld [vmem:[%s170_s6 + $0x8] sm:$0xf] (%p37_p5) }
  0x17   : > { %188 = vst [vmem:[%s168_s7] sm:$0xf] (%p37_p5), %v187_v0 }
  0x18   : > { %190 = vst [vmem:[%s168_s7 + $0x4] sm:$0xf] %v189_v1 }
  0x19 PF: > { %p675_p10 = scmp.ge.s32.totalorder %s894_s18, 1  ;;  %p217_p11 = scmp.lt.s32.totalorder %s894_s18, 3 }
  0x1b   : > { %p218_p12 = pnand %p675_p10, %p217_p11 }
  0x1c   : > { %s981_s8 = sand.u32 (!%p218_p12), 1, %s886_s16   ;;  %s720_s10 = sshll.u32 (!%p218_p12), %s669_s19, 3 }
  0x1d   : > { %221 = sbr.rel (%p218_p12) target bundleno = 578 (0x242), region = 69  ;;  %s987_s11 = sshll.u32 (!%p218_p12), %s981_s8, 3 }
  0x1e   : > { %s226_s14 = scalar_lea.vmem (!%p218_p12), [#allocation2], %s987_s11  ;;  %s567_s23 = scalar_lea.hbm (!%p218_p12), %s1119_s4, %s720_s10 }
  0x1f   : > { %s246_s27 = scalar_lea.vmem (!%p218_p12), [#allocation3], %s987_s11  ;;  %s253_s19 = scalar_lea.vmem (!%p218_p12), [#allocation5], %s987_s11 }
  0x20   : > { %s555_s28 = sshll.u32 (!%p218_p12), %s246_s27, 4  ;;  %s569_s30 = sshll.u32 (!%p218_p12), %s253_s19, 4  ;;  %s556_s28 = int_to_ptr.vmem [resolvable:$true] %s555_s28  ;;  %s1066_s30 = int_to_ptr.vmem [resolvable:$true] %s569_s30 }
  0x21   : > { %s1062_s5 = sshll.u32 (!%p218_p12), %s567_s23, 4  ;;  %s538_s6 = scalar_lea.sflag (!%p218_p12), [#allocation4], %s981_s8  ;;  %s572_s5 = int_to_ptr.hbm [resolvable:$true] %s1062_s5 }
  0x22   : > { %v277_v2 = vld [vmem:[%s1117_s2 + $0x30] sm:$0xff]  ;;  %v896_v3 = vmov 0   ;;  %v275_v4 = vld [vmem:[%s1117_s2 + $0x20] sm:$0xff]  ;;  %vm345_vm0 = vcmask 130048   ;;  %v278_v9 = vld [vmem:[%s1117_s2 + $0x38] sm:$0xff]  ;;  %v897_v23 = vmov 1  }
  0x23   : > { %781 = vset.pattern.permute.xlu1 %v896_v3  ;;  %780 = vset.pattern.permute.xlu0 %v896_v3  ;;  %v724_v5 = vld [vmem:[%s226_s14] sm:$0xff]  ;;  %v273_v6 = vld [vmem:[%s1117_s2 + $0x10] sm:$0xff]  ;;  %v274_v11 = vld [vmem:[%s1117_s2 + $0x18] sm:$0xff]  ;;  %vm425_vm1 = vcmask 523264   ;;  %v898_v56 = vmov 2   ;;  %vm462_vm2 = vcmask 261120   ;;  %s553_s14 = scalar_lea.hbm %s1118_s3, %s720_s10 }
  0x24   : > { %311 = vperm.xlu0 %780, %v277_v2   ;;  %301 = vperm.xlu1 %781, %v275_v4   ;;  %v727_v7 = vld [vmem:[%s1116_s1 + $0x10] sm:$0xff]  ;;  %v725_v8 = vld [vmem:[%s1116_s1] sm:$0xff]  ;;  %v276_v10 = vld [vmem:[%s1117_s2 + $0x28] sm:$0xff]  ;;  %vm484_vm3 = vcmask 1043456   ;;  %vm509_vm4 = vcmask 1047556   ;;  %s1059_s29 = sshll.u32 %s553_s14, 4  ;;  %s558_s29 = int_to_ptr.hbm [resolvable:$true] %s1059_s29 }
  0x25   : > { %782 = vset.pattern.permute.xlu2 %v896_v3  ;;  %732 = vmatpush.bf16.msra.mxu3 %v724_v5  ;;  %v272_v12 = vld [vmem:[%s1117_s2 + $0x8] sm:$0xff]  ;;  %v1019_v13 = vld [vmem:[%s1117_s2] sm:$0xff]  ;;  %v728_v14 = vld [vmem:[%s1116_s1 + $0x18] sm:$0xff]  ;;  %s814_s7 = sshra.s32 %s558_s29, 4  ;;  %s820_s12 = scalar_lea.hbm %s1118_s3, 16  ;;  %s815_s7 = int_to_ptr.hbm [resolvable:$true] %s814_s7 }
  0x26   : > { %291 = vperm.xlu2 %782, %v273_v6   ;;  %365 = vmatpush.bf16.msra.mxu0 %v724_v5  ;;  %v726_v15 = vld [vmem:[%s1116_s1 + $0x8] sm:$0xff]  ;;  %v729_v53 = vld [vmem:[%s1116_s1 + $0x20] sm:$0xff]  ;;  %s816_s11 = scalar_lea.hbm %s815_s7, 8  ;;  %p821_p2 = scmp.lt.s32.totalorder %s815_s7, %s1118_s3 }
  0x27   : > { %v730_v54 = vld [vmem:[%s1116_s1 + $0x28] sm:$0xff]  ;;  %p817_p13 = scmp.ne.s32.totalorder %s815_s7, %s816_s11  ;;  %p822_p3 = scmp.lt.s32.totalorder %s820_s12, %s816_s11 }
  0x28   : > { %701 = vmatmul.msk.bf16.vlgmr.msra.gmra.mxu3 %vm345_vm0, %v727_v7 }
  0x29   : > { %699 = vmatmul.msk.bf16.vlgmr.msra.gmra.mxu0 %vm345_vm0, %v725_v8  ;;  %p818_p0 = pnand %p817_p13, %p962_p6  ;;  %p823_p4 = por %p822_p3, %p821_p2 }
  0x2b   : > { %p819_p1 = pneg %p818_p0 }
  0x2c   : > { %316 = vperm.xlu0 %780, %v278_v9   ;;  %306 = vperm.xlu1 %781, %v276_v10   ;;  %v731_v10 = vld [vmem:[%s1116_s1 + $0x30] sm:$0xff] }
  0x2d   : > { %p824_p5 = pnand %p823_p4, %p819_p1 }
  0x2e   : > { %296 = vperm.xlu2 %782, %v274_v11  }
  0x34   : > { %286 = vperm.xlu1 %781, %v272_v12   ;;  %281 = vperm.xlu0 %780, %v1019_v13  }
  0x36   : > { %783 = vset.pattern.permute.xlu2 %v897_v23 }
  0x37   : > { %408 = vperm.xlu2 %783, %v273_v6  }
  0x38   : > { %702 = vmatmul.msk.bf16.gmra.mxu3 %vm345_vm0, %v728_v14 }
  0x39   : > { %700 = vmatmul.msk.bf16.gmra.mxu0 %vm345_vm0, %v726_v15 }
  0x3c   : > { %785 = vset.pattern.permute.xlu1 %v897_v23  ;;  %784 = vset.pattern.permute.xlu0 %v897_v23 }
  0x3d   : > { %400 = vperm.xlu1 %785, %v1019_v13   ;;  %412 = vperm.xlu0 %784, %v274_v11  }
  0x3f   : > { %404 = vperm.xlu2 %783, %v272_v12  }
  0x45   : > { %786 = vset.pattern.permute.xlu1 %v898_v56  ;;  %787 = vset.pattern.permute.xlu0 %v898_v56 }
  0x46   : > { %480 = vperm.xlu1 %786, %v1019_v13  }
  0x80   : > { %v292_v22 = vpop.permute.xlu2 %291 }
  0x88   : > { %v297_v32 = vpop.permute.xlu2 %296 }
  0x91   : > { %v409_v58 = vpop.permute.xlu2 %408 }
  0x96   : > { %v312_v20 = vpop.permute.xlu0 %311  ;;  %v302_v21 = vpop.permute.xlu1 %301 }
  0x99   : > { %v405_v60 = vpop.permute.xlu2 %404 }
  0x9e   : > { %v317_v26 = vpop.permute.xlu0 %316  ;;  %v307_v27 = vpop.permute.xlu1 %306 }
  0xa6   : > { %v367_v16 = vpop.f32.mrf.mxu0  ;;  %v282_v37 = vpop.permute.xlu0 %281 }
  0xa7   : > { %v287_v42 = vpop.permute.xlu1 %286  ;;  %v368_v44 = vadd.f32 %v367_v16, %v282_v37 }
  0xa9   : > { %v387_v49 = vmax.f32 %v368_v44, 0.0 }
  0xab   : > { %v377_v17 = vpop.f32.mrf.mxu3 }
  0xac   : > { %v378_v34 = vadd.f32 %v377_v17, %v302_v21 }
  0xae   : > { %v369_v18 = vpop.f32.mrf.mxu0  ;;  %v391_v43 = vmax.f32 %v378_v34, 0.0 }
  0xaf   : > { %v370_v45 = vadd.f32 %v369_v18, %v287_v42  ;;  %v413_v61 = vpop.permute.xlu0 %412  ;;  %v401_v63 = vpop.permute.xlu1 %400 }
  0xb1   : > { %v388_v50 = vmax.f32 %v370_v45, 0.0 }
  0xb3   : > { %v379_v19 = vpop.f32.mrf.mxu3  ;;  %v395_v52 = vpack.c.bf16 %v388_v50, %v387_v49 }
  0xb4   : > { %v380_v30 = vadd.f32 %v379_v19, %v307_v27 }
  0xb6   : > { %v372_v24 = vpop.f32.mrf.mxu0  ;;  %v392_v38 = vmax.f32 %v380_v30, 0.0 }
  0xb7   : > { %v373_v39 = vadd.f32 %v372_v24, %v292_v22 }
  0xb8   : > { %v397_v48 = vpack.c.bf16 %v392_v38, %v391_v43  ;;  %v481_v11 = vpop.permute.xlu1 %480 }
  0xb9   : > { %v389_v46 = vmax.f32 %v373_v39, 0.0 }
  0xbb   : > { %v382_v25 = vpop.f32.mrf.mxu3 }
  0xbc   : > { %v383_v28 = vadd.f32 %v382_v25, %v312_v20 }
  0xbe   : > { %v374_v33 = vpop.f32.mrf.mxu0  ;;  %v393_v35 = vmax.f32 %v383_v28, 0.0 }
  0xbf   : > { %v375_v40 = vadd.f32 %v374_v33, %v297_v32 }
  0xc1   : > { %v390_v47 = vmax.f32 %v375_v40, 0.0 }
  0xc3   : > { %v384_v29 = vpop.f32.mrf.mxu3  ;;  %v396_v51 = vpack.c.bf16 %v390_v47, %v389_v46 }
  0xc4   : > { %v385_v31 = vadd.f32 %v384_v29, %v317_v26 }
  0xc6   : > { %v394_v36 = vmax.f32 %v385_v31, 0.0 }
  0xc8   : > { %v398_v41 = vpack.c.bf16 %v394_v36, %v393_v35 }
  0xca   : > { %436 = vmatpush.bf16.msra.mxu1 %v398_v41 }
  0xce   : > { %437 = vmatpush.bf16.msra.mxu1 %v397_v48 }
  0xd2   : > { %438 = vmatpush.bf16.msra.mxu1 %v396_v51 }
  0xd6   : > { %439 = vmatpush.bf16.msra.mxu1 %v395_v52 }
  0xd9   : > { %711 = vmatmul.msk.bf16.vlgmr.msra.gmra.mxu1 %vm425_vm1, %v729_v53 }
  0xe9   : > { %712 = vmatmul.msk.bf16.gmra.mxu1 %vm425_vm1, %v730_v54 }
 0x156   : > { %v441_v55 = vpop.f32.mrf.mxu1 }
 0x157   : > { %v442_v3 = vadd.f32 %v441_v55, %v401_v63 }
 0x159   : > { %v451_v8 = vmax.f32 %v442_v3, 0.0 }
 0x15e   : > { %v443_v57 = vpop.f32.mrf.mxu1 }
 0x15f   : > { %v444_v1 = vadd.f32 %v443_v57, %v405_v60 }
 0x161   : > { %v452_v6 = vmax.f32 %v444_v1, 0.0 }
 0x163   : > { %v455_v9 = vpack.c.bf16 %v452_v6, %v451_v8 }
 0x166   : > { %v446_v59 = vpop.f32.mrf.mxu1 }
 0x167   : > { %v447_v62 = vadd.f32 %v446_v59, %v409_v58 }
 0x169   : > { %v453_v4 = vmax.f32 %v447_v62, 0.0 }
 0x16e   : > { %v448_v0 = vpop.f32.mrf.mxu1 }
 0x16f   : > { %v449_v2 = vadd.f32 %v448_v0, %v413_v61 }
 0x171   : > { %v454_v5 = vmax.f32 %v449_v2, 0.0 }
 0x173   : > { %v456_v7 = vpack.c.bf16 %v454_v5, %v453_v4 }
 0x175   : > { %472 = vmatpush.bf16.msra.mxu2 %v456_v7 }
 0x179   : > { %473 = vmatpush.bf16.msra.mxu2 %v455_v9 }
 0x17c   : > { %717 = vmatmul.msk.bf16.vlgmr.msra.gmra.mxu2 %vm462_vm2, %v731_v10 }
 0x1ff   : > { %v475_v12 = vpop.f32.mrf.mxu2 }
 0x200   : > { %v483_v13 = vadd.f32 %v481_v11, %v475_v12 }
 0x202   : > { %v485_v14 = vsel %vm484_vm3, %v483_v13, -inf  ;;  %v510_v15 = vsel %vm509_vm4, %v483_v13, -inf }
 0x203   : > { %v486_v16 = vrot.slane %v485_v14, 4  ;;  %v511_v17 = vrot.slane %v510_v15, 4 }
 0x205   : > { %v487_v18 = vmax.f32 %v485_v14, %v486_v16  ;;  %v512_v19 = vmax.f32 %v510_v15, %v511_v17 }
 0x207   : > { %v488_v20 = vrot.slane %v487_v18, 2  ;;  %v513_v21 = vrot.slane %v512_v19, 2  ;;  %v477_v22 = vpop.f32.mrf.mxu2 }
 0x209   : > { %v489_v23 = vmax.f32 %v487_v18, %v488_v20  ;;  %v514_v24 = vmax.f32 %v512_v19, %v513_v21 }
 0x20b   : > { %v490_v25 = vrot.slane %v489_v23, 1  ;;  %v515_v26 = vrot.slane %v514_v24, 1 }
 0x20d   : > { %v491_v27 = vmax.f32 %v489_v23, %v490_v25  ;;  %v516_v28 = vmax.f32 %v514_v24, %v515_v26 }
 0x20f   : > { %v1042_v29 = vsub.f32 %v483_v13, %v491_v27  ;;  %v1044_v30 = vsub.f32 %v483_v13, %v516_v28 }
 0x211   : > { %v493_v31 = vmul.f32 1.442695, %v1042_v29  ;;  %v518_v32 = vmul.f32 1.442695, %v1044_v30 }
 0x213   : > { %788 = vpow2.f32 %v493_v31 }
 0x214   : > { %790 = vpow2.f32 %v518_v32 }
 0x219   : > { %v789_v33 = vpop.eup %788 }
 0x21a   : > { %v791_v34 = vpop.eup %790  ;;  %v495_v35 = vsel %vm484_vm3, %v789_v33, 0.0 }
 0x21b   : > { %v496_v36 = vrot.slane %v495_v35, 4  ;;  %v521_v37 = vrot.slane %v791_v34, 4 }
 0x21d   : > { %v497_v38 = vadd.f32 %v496_v36, %v495_v35  ;;  %v523_v39 = vsel %vm484_vm3, %v521_v37, 0.0 }
 0x21e   : > { %v524_v40 = vrot.slane %v523_v39, 4 }
 0x21f   : > { %v498_v41 = vrot.slane %v497_v38, 2 }
 0x220   : > { %v525_v42 = vadd.f32 %v524_v40, %v523_v39 }
 0x221   : > { %v499_v43 = vadd.f32 %v498_v41, %v497_v38 }
 0x222   : > { %v526_v44 = vrot.slane %v525_v42, 2 }
 0x223   : > { %v500_v45 = vrot.slane %v499_v43, 1 }
 0x224   : > { %v527_v46 = vadd.f32 %v526_v44, %v525_v42 }
 0x225   : > { %v501_v47 = vadd.f32 %v500_v45, %v499_v43 }
 0x226   : > { %v528_v48 = vrot.slane %v527_v46, 1 }
 0x227   : > { %792 = vrcp.f32 %v501_v47 }
 0x228   : > { %v529_v49 = vadd.f32 %v528_v48, %v527_v46  ;;  %794 = vlog2.f32 %v501_v47 }
 0x22a   : > { %796 = vrcp.f32 %v529_v49 }
 0x22b   : > { %798 = vlog2.f32 %v529_v49 }
 0x22d   : > { %v793_v50 = vpop.eup %792 }
 0x22e   : > { %v795_v51 = vpop.eup %794  ;;  %v503_v52 = vmul.f32 %v793_v50, %v789_v33 }
 0x22f   : > { %v506_v53 = vmul.f32 0.6931472, %v795_v51 }
 0x230   : > { %v797_v54 = vpop.eup %796  ;;  %504 = vst [vmem:[%s246_s27] sm:$0xf] %v503_v52 }
 0x231   : > { %v799_v55 = vpop.eup %798  ;;  %v531_v56 = vmul.f32 %v797_v54, %v791_v34  ;;  %v507_v57 = vsub.f32 %v1042_v29, %v506_v53 }
 0x232   : > { %v534_v58 = vmul.f32 0.6931472, %v799_v55 }
 0x233   : > { %532 = vst [vmem:[%s246_s27] sm:$0xf0] %v531_v56 }
 0x234   : > { %827 = shalt.err (!%p824_p5)
}
 0x235   : > { %733 = dma.vmem_to_hbm [thread:$0]  (%p962_p6), %s556_s28, 128, %s558_s29, %s538_s6   ;;  %508 = vst [vmem:[%s253_s19] sm:$0xf] %v507_v57  ;;  %v535_v59 = vsub.f32 %v1044_v30, %v534_v58 }
 0x236   : > { %s543_s20 = scalar_lea.sflag [#allocation6], %s981_s8  ;;  %s842_s22 = sshra.s32 %s572_s5, 4  ;;  %s843_s22 = int_to_ptr.hbm [resolvable:$true] %s842_s22 }
 0x237   : > { %536 = vst [vmem:[%s253_s19] sm:$0xf0] %v535_v59  ;;  %s844_s23 = scalar_lea.hbm %s843_s22, 8  ;;  %s848_s11 = scalar_lea.hbm %s1119_s4, 16 }
 0x238   : > { %p845_p7 = scmp.ne.s32.totalorder %s843_s22, %s844_s23  ;;  %p849_p12 = scmp.lt.s32.totalorder %s843_s22, %s1119_s4 }
 0x239   : > { %p850_p13 = scmp.lt.s32.totalorder %s848_s11, %s844_s23 }
 0x23a   : > { %p846_p10 = pnand %p845_p7, %p962_p6 }
 0x23b   : > { %p851_p0 = por %p850_p13, %p849_p12 }
 0x23c   : > { %p847_p11 = pneg %p846_p10 }
 0x23e   : > { %p852_p1 = pnand %p851_p0, %p847_p11 }
 0x240   : > { %855 = shalt.err (!%p852_p1)
}
 0x241   : > { %734 = dma.vmem_to_hbm [thread:$0]  (%p962_p6), %s1066_s30, 128, %s572_s5, %s543_s20  }
 0x242 PF: > { %s583_s8 = sand.u32 1, %s882_s15   ;;  %p738_p2 = pnand %p672_p9, %p966_p8 }
 0x243   : > { %s584_s28 = scalar_lea.sflag [#allocation4], %s583_s8 }
 0x244   : > { %p739_p3 = pneg %p738_p2 }
 0x246   : > { %873 = dma.done.wait (%p739_p3), %s584_s28, 128  }
 0x247   : > { %875 = vsyncadd (%p739_p3), %s584_s28, 4294967168  ;;  %s594_s29 = scalar_lea.sflag [#allocation6], %s583_s8 }
 0x248   : > { %877 = dma.done.wait (%p739_p3), %s594_s29, 128  }
 0x249   : > { %879 = vsyncadd (%p739_p3), %s594_s29, 4294967168  ;;  %p18_p6 = scmp.ge.s32.totalorder %s947_s21, 4   ;;  %s1122_s15 = smov %s886_s16 }
 0x24a   : > { %s1123_s16 = smov %s890_s17  ;;  %s1124_s17 = smov %s960_s24 }
 0x24b   : > { %s1125_s18 = smov %s947_s21  ;;  %20 = sbr.rel (!%p18_p6) target bundleno = 5 (0x5), region = 130 }
 0x250   :  { %600 = vsyncpa [#allocation4], 1 }
 0x251   :  { %602 = vsyncpa [#allocation4 + $0x1], 1 }
 0x252   :  { %603 = vsyncpa [#allocation6], 1 }
 0x253   :  { %605 = vsyncpa [#allocation6 + $0x1], 1 }

</bundles_post_ra>
